<compile_context>
chip_gen: v7x
topology: tpu7x:2x2x1
jax: 0.10.0
libtpu: 0.0.40
codegen_flags: <defaults>
</compile_context>

<pallas_src>
import functools

import jax
import jax.numpy as jnp
from jax.experimental import pallas as pl
from jax.experimental.pallas import tpu as pltpu


# Pinned conventions (library path never probes the device):
#   _ROLL_SIGN = +1  <=>  pltpu.roll follows jnp.roll (y[p] = x[p - shift]).
#   _CARRY_DTYPE     =   dtype the rolled activations are carried in.
_ROLL_SIGN = 1
_CARRY_DTYPE = jnp.bfloat16


def _calibrate_roll():
    """Test-harness-only calibration (kept out of the library / jit path):
    verifies the pinned pltpu.roll direction, and falls back to f32 lane
    rolls if packed-bf16 rolls do not lower on this Mosaic version."""
    global _ROLL_SIGN, _CARRY_DTYPE

    def probe(x_ref, o_ref):
        o_ref[...] = pltpu.roll(x_ref[...], 1, 1)

    def run(dtype):
        x = jnp.tile(jnp.arange(256, dtype=jnp.float32)[None, :],
                     (8, 1)).astype(dtype)
        y = pl.pallas_call(
            probe, out_shape=jax.ShapeDtypeStruct((8, 256), dtype))(x)
        # jnp.roll convention => y[0, 0] == 255 ; flipped convention => 1.
        return 1 if float(y[0, 0]) > 128.0 else -1

    try:
        _ROLL_SIGN = run(jnp.bfloat16)
        _CARRY_DTYPE = jnp.bfloat16
    except Exception:   # packed-bf16 lane roll unsupported: carry f32 instead
        _CARRY_DTYPE = jnp.float32
        _ROLL_SIGN = run(jnp.float32)


# -------------------------------- kernel ----------------------------------

def eda_kernel(x_ref, w1_ref, w3_ref, bias_ref, out_ref, *,
               H, W, Cin, K, dilated, roll_sign, carry_dtype):
    """One batch group per grid step, NCHW-native.

    x_ref   : (Cin+1, L) f32   L = images_per_block*H*W; row Cin is all-ones
                               (folds the 1x1 bias / BN0 shift into w1).
    w1_ref  : (K, Cin+1) bf16  1x1 stem, BN0 scale+shift folded in.
    w3_ref  : (4, 3, K, K) bf16  per-tap matrices of the 4 separable convs;
                               slabs: 3x1, 1x3 (BN1 folded), dil 3x1,
                               dil 1x3 (BN2 folded); taps: minus/center/plus.
    bias_ref: (K, 8) f32       cols 0..3 = conv3x1_1 bias, BN1 shift,
                               conv3x1_2 bias, BN2 shift.
    out_ref : (K+Cin, L) f32   rows [0,K) features, [K,K+Cin) residual input.
    """
    L = x_ref.shape[-1]
    HW = H * W

    x = x_ref[...]                              # (Cin+1, L) f32
    bp = bias_ref[...]                          # (K, 8) f32
    b31a, t1, b31b, t2 = (bp[:, i:i + 1] for i in range(4))

    # Flattened (image, h, w) lane coordinates.  pos % HW makes the zero
    # 'same'-padding masks also kill cross-image contamination from the lane
    # rolls, so the whole batch group shares a single roll per tap.
    pos = jax.lax.broadcasted_iota(jnp.int32, (1, L), 1) % HW
    hi = pos // W
    wi = pos % W

    def shift(v, s):
        # v'[:, p] = v[:, (p + s) % L]; wrapped lanes are masked by callers.
        amt = (-s * roll_sign) % L
        return v if amt == 0 else pltpu.roll(v, amt, 1)

    def conv3(act, slab, step, m_neg, m_pos):
        """3-tap separable conv as three accumulating (K,K)@(K,L) matmuls.

        Rolls + boundary masks are applied to the (bf16) activations, not the
        result, so the taps sum in the MXU result path (in place on v7x) and
        the live f32 result stays at (K, L) instead of (3K, L).
        """
        def tap(t, operand):
            return jnp.dot(w3_ref[slab, t], operand.astype(jnp.bfloat16),
                           preferred_element_type=jnp.float32)

        acc = tap(1, act)
        acc = acc + tap(0, jnp.where(m_neg, shift(act, -step), 0.0))
        acc = acc + tap(2, jnp.where(m_pos, shift(act, step), 0.0))
        return acc

    # --- stage 0: 1x1 conv (BN0 + bias folded via the ones channel) -> ReLU.
    # bf16 operands keep the tiny-Cin stem off v5e's slow f32 MXU path.
    h = jnp.dot(w1_ref[...], x.astype(jnp.bfloat16),
                preferred_element_type=jnp.float32)              # (K, L)
    hb = jnp.maximum(h, 0.0).astype(carry_dtype)

    # --- stage 1: conv3x1 (+bias) -> conv1x3 (BN1 scale folded) -> ReLU ----
    hb = (conv3(hb, 0, W, hi >= 1, hi < H - 1) + b31a).astype(carry_dtype)
    h = conv3(hb, 1, 1, wi >= 1, wi < W - 1) + t1
    hb = jnp.maximum(h, 0.0).astype(carry_dtype)

    # --- stage 2: dilated conv3x1 (+bias) -> dilated conv1x3 (BN2) -> ReLU -
    d = dilated
    hb = (conv3(hb, 2, d * W, hi >= d, hi < H - d) + b31b).astype(carry_dtype)
    h = conv3(hb, 3, d, wi >= d, wi < W - d) + t2
    h = jnp.maximum(h, 0.0)

    # Dropout2d is identity in eval mode.
    # Residual concat via disjoint, sublane-aligned channel-slice writes
    # (K = 40 is a multiple of 8); every store is full-lane-width.
    out_ref[:K, :] = h
    out_ref[K:, :] = x[:Cin, :]


# ------------------------------- wrapper -----------------------------------

def eda_forward_nchw(x_nchw, kp, *, dilated, images_per_block=None):
    N, Cin, H, W = x_nchw.shape
    K = kp["bias"].shape[0]
    HW = H * W

    if images_per_block is None:
        # Fold the whole (small) batch into one lane-dense block; for N >= 4
        # keep >= 2 blocks so v7x's two TensorCores both get work.
        # TODO(synk): also cap images_per_block by a per-generation VMEM
        # budget once realistic feature-map sizes / H-tiling are added.
        images_per_block = N if N <= 2 else max(
            d for d in range(1, N // 2 + 1) if N % d == 0)
    assert N % images_per_block == 0
    G = N // images_per_block
    L = images_per_block * HW

    # Channels-major with the batch folded into the lane axis: (Cin+1, N*HW).
    # The appended all-ones channel folds the 1x1 bias / BN0 shift into w1.
    x2 = x_nchw.reshape(N, Cin, HW)
    ones = jnp.ones((N, 1, HW), x_nchw.dtype)
    xl = (jnp.concatenate([x2, ones], axis=1)
          .transpose(1, 0, 2).reshape(Cin + 1, N * HW))

    kernel = functools.partial(
        eda_kernel, H=H, W=W, Cin=Cin, K=K, dilated=dilated,
        roll_sign=_ROLL_SIGN, carry_dtype=_CARRY_DTYPE)

    out = pl.pallas_call(
        kernel,
        out_shape=jax.ShapeDtypeStruct((K + Cin, N * HW), jnp.float32),
        grid=(G,),
        in_specs=[
            pl.BlockSpec((Cin + 1, L), lambda g: (0, g)),        # x (+ ones)
            pl.BlockSpec(kp["w1"].shape, lambda g: (0, 0)),      # 1x1 stem
            pl.BlockSpec(kp["w3"].shape, lambda g: (0, 0, 0, 0)),  # tap mats
            pl.BlockSpec(kp["bias"].shape, lambda g: (0, 0)),    # bias slab
        ],
        out_specs=pl.BlockSpec((K + Cin, L), lambda g: (0, g)),
        compiler_params=pltpu.CompilerParams(
            dimension_semantics=("parallel",)),
    )(xl, kp["w1"], kp["w3"], kp["bias"])

    return (out.reshape(K + Cin, N, HW)
               .transpose(1, 0, 2).reshape(N, K + Cin, H, W))


# -------------------------- parameter generation ---------------------------

def init_params(key, Cin, K):
    ks = jax.random.split(key, 13)

    def u(k, shape, fan_in):
        bound = 1.0 / float(fan_in) ** 0.5
        return jax.random.uniform(k, shape, jnp.float32, -bound, bound)

    p = {}
    p["w_1x1"] = u(ks[0], (K, Cin, 1, 1), Cin)
    p["b_1x1"] = u(ks[1], (K,), Cin)
    p["w_31_1"] = u(ks[2], (K, K, 3, 1), 3 * K)
    p["b_31_1"] = u(ks[3], (K,), 3 * K)
    p["w_13_1"] = u(ks[4], (K, K, 1, 3), 3 * K)
    p["b_13_1"] = u(ks[5], (K,), 3 * K)
    p["w_31_2"] = u(ks[6], (K, K, 3, 1), 3 * K)
    p["b_31_2"] = u(ks[7], (K,), 3 * K)
    p["w_13_2"] = u(ks[8], (K, K, 1, 3), 3 * K)
    p["b_13_2"] = u(ks[9], (K,), 3 * K)
    for i, name in enumerate(["bn0", "bn1", "bn2"]):
        kk = jax.random.split(ks[10 + i], 4)
        p[name] = dict(
            gamma=1.0 + 0.1 * jax.random.normal(kk[0], (K,), jnp.float32),
            beta=0.1 * jax.random.normal(kk[1], (K,), jnp.float32),
            mean=0.1 * jax.random.normal(kk[2], (K,), jnp.float32),
            var=jnp.abs(jax.random.normal(kk[3], (K,), jnp.float32)) + 0.5,
        )
    return p


def to_kernel_params(p, eps=1e-5):
    """PyTorch-shaped (OIHW) params -> packed kernel-friendly matrices."""
    K = p["w_1x1"].shape[0]

    def bn_scale(bn):
        return bn["gamma"] / jnp.sqrt(bn["var"] + eps)

    s0, s1, s2 = bn_scale(p["bn0"]), bn_scale(p["bn1"]), bn_scale(p["bn2"])
    t0 = (p["b_1x1"] - p["bn0"]["mean"]) * s0 + p["bn0"]["beta"]
    t1 = (p["b_13_1"] - p["bn1"]["mean"]) * s1 + p["bn1"]["beta"]
    t2 = (p["b_13_2"] - p["bn2"]["mean"]) * s2 + p["bn2"]["beta"]

    # 1x1 stem: fold BN0 scale into the rows and the bias/BN0 shift into an
    # extra column that multiplies the all-ones channel appended by the
    # wrapper.  (K, Cin+1), bf16.
    w1 = jnp.concatenate(
        [p["w_1x1"][:, :, 0, 0] * s0[:, None], t0[:, None]], axis=1)

    def taps_h(w):   # (K, K, 3, 1) -> (3, K, K): tap (minus/center/plus), O, I
        return jnp.transpose(w[:, :, :, 0], (2, 0, 1))

    def taps_w(w):   # (K, K, 1, 3) -> (3, K, K)
        return jnp.transpose(w[:, :, 0, :], (2, 0, 1))

    w31a = taps_h(p["w_31_1"])
    w13a = taps_w(p["w_13_1"]) * s1[None, :, None]          # fold BN1 scale
    w31b = taps_h(p["w_31_2"])
    w13b = taps_w(p["w_13_2"]) * s2[None, :, None]          # fold BN2 scale
    w3 = jnp.stack([w31a, w13a, w31b, w13b], 0).astype(jnp.bfloat16)

    zeros = jnp.zeros((K,), jnp.float32)
    bias = jnp.stack([p["b_31_1"], t1, p["b_31_2"], t2,
                      zeros, zeros, zeros, zeros], axis=1)   # (K, 8)

    return {"w1": w1.astype(jnp.bfloat16),
            "w3": w3,
            "bias": bias.astype(jnp.float32)}


# ------------------------------ reference ----------------------------------

def eda_ref_nchw(x, p, dilated, eps=1e-5):
    def conv(xx, w, b, pad, dil):
        y = jax.lax.conv_general_dilated(
            xx, w, (1, 1), [(pad[0], pad[0]), (pad[1], pad[1])],
            rhs_dilation=dil, dimension_numbers=("NCHW", "OIHW", "NCHW"))
        return y + b.reshape(1, -1, 1, 1)

    def bn(xx, d):
        c = lambda v: v.reshape(1, -1, 1, 1)
        return (xx - c(d["mean"])) / jnp.sqrt(c(d["var"]) + eps) \
            * c(d["gamma"]) + c(d["beta"])

    out = jax.nn.relu(bn(conv(x, p["w_1x1"], p["b_1x1"], (0, 0), (1, 1)),
                         p["bn0"]))
    out = conv(out, p["w_31_1"], p["b_31_1"], (1, 0), (1, 1))
    out = conv(out, p["w_13_1"], p["b_13_1"], (0, 1), (1, 1))
    out = jax.nn.relu(bn(out, p["bn1"]))
    out = conv(out, p["w_31_2"], p["b_31_2"], (dilated, 0), (dilated, 1))
    out = conv(out, p["w_13_2"], p["b_13_2"], (0, dilated), (1, dilated))
    out = jax.nn.relu(bn(out, p["bn2"]))
    return jnp.concatenate([out, x], axis=1)


# --------------------------------- main -------------------------------------

if __name__ == "__main__":
    N, Cin, H, W = 2, 4, 16, 16
    K, dilated = 40, 2

    key = jax.random.PRNGKey(0)
    kx, kparam = jax.random.split(key)
    x_nchw = jax.random.normal(kx, (N, Cin, H, W), jnp.float32)

    params = init_params(kparam, Cin, K)
    kparams = to_kernel_params(params)

    # Test-harness-only: verify pinned roll convention / bf16-roll support.
    _calibrate_roll()

    out = eda_forward_nchw(x_nchw, kparams, dilated=dilated)
    out = jax.block_until_ready(out)

    assert out.shape == (N, K + Cin, H, W), out.shape

    ref = eda_ref_nchw(x_nchw, params, dilated)
    max_err = float(jnp.max(jnp.abs(out - ref)))
    if max_err > 5e-2:   # bf16 matmul operands, f32 accumulation
        raise AssertionError(f"Pallas kernel mismatch vs reference: {max_err}")

    print("KERNEL_OK")
</pallas_src>

<mosaic_0001>
module attributes {stable_mosaic.version = 11 : i64} {
  func.func @probe(%arg0: memref<8x256xbf16, #tpu.memory_space<vmem>>, %arg1: memref<8x256xbf16, #tpu.memory_space<vmem>>) attributes {dimension_semantics = [], scalar_prefetch = 0 : i64, scratch_operands = 0 : i64, tpu.core_type = #tpu.core_type<tc>} {
    %c0 = arith.constant 0 : index
    %c0_0 = arith.constant 0 : index
    %0 = vector.load %arg0[%c0, %c0_0] : memref<8x256xbf16, #tpu.memory_space<vmem>>, vector<8x256xbf16>
    %c1_i32 = arith.constant 1 : i32
    %1 = tpu.dynamic_rotate %0 by %c1_i32 dim 1 : vector<8x256xbf16>, i32 -> vector<8x256xbf16>
    %c0_1 = arith.constant 0 : index
    %c0_2 = arith.constant 0 : index
    %2 = vector.load %arg1[%c0_1, %c0_2] : memref<8x256xbf16, #tpu.memory_space<vmem>>, vector<8x256xbf16>
    tpu.vector_store %arg1[%c0_1, %c0_2], %1 {strides = array<i32>} : memref<8x256xbf16, #tpu.memory_space<vmem>>, vector<8x256xbf16>,
    return
  }
}

module attributes {stable_mosaic.version = 11 : i64} {
  func.func @probe(%arg0: memref<8x256xf32, #tpu.memory_space<vmem>>, %arg1: memref<8x256xf32, #tpu.memory_space<vmem>>) attributes {dimension_semantics = [], scalar_prefetch = 0 : i64, scratch_operands = 0 : i64, tpu.core_type = #tpu.core_type<tc>} {
    %c0 = arith.constant 0 : index
    %c0_0 = arith.constant 0 : index
    %0 = vector.load %arg0[%c0, %c0_0] : memref<8x256xf32, #tpu.memory_space<vmem>>, vector<8x256xf32>
    %c1_i32 = arith.constant 1 : i32
    %1 = tpu.dynamic_rotate %0 by %c1_i32 dim 1 : vector<8x256xf32>, i32 -> vector<8x256xf32>
    %c0_1 = arith.constant 0 : index
    %c0_2 = arith.constant 0 : index
    %2 = vector.load %arg1[%c0_1, %c0_2] : memref<8x256xf32, #tpu.memory_space<vmem>>, vector<8x256xf32>
    tpu.vector_store %arg1[%c0_1, %c0_2], %1 {strides = array<i32>} : memref<8x256xf32, #tpu.memory_space<vmem>>, vector<8x256xf32>,
    return
  }
}

</mosaic_0001>

<bundles_post_ra>
// kernel: tpu_custom_call.1
= control target key start
LH: loop header
LB: loop body
LE: loop exit
PB: predicated region body
PF: predicated region fallthrough
CT: control target
= control target key end

     0   :  { %6 = vsyncpa [#allocation3], 0  ;;  %s137_s0 = inlined_call_operand.hbm [shape: f32[8,256], index: 0, kind: input, shape index: {}]   ;;  %s138_s1 = inlined_call_operand.hbm [shape: f32[8,256], index: 1, kind: output, shape index: {}]  }
   0x1   :  { %7 = vsyncpa [#allocation4], 0  ;;  %s100_s6 = smov [#allocation2]   ;;  %s52_s10 = scalar_lea.hbm %s137_s0, 256 }
   0x2   :  { %s14_s7 = sshll.u32 %s100_s6, 4  ;;  %p53_p0 = scmp.ne.s32.totalorder %s137_s0, %s52_s10  ;;  %s15_s7 = int_to_ptr.vmem [resolvable:$true] %s14_s7 }
   0x3   :  { %p56_p1 = scmp.lt.u32.totalorder %s52_s10, %s137_s0 }
   0x5   :  { %p58_p2 = pnand %p56_p1, %p53_p0 }
   0x7   :  { %61 = shalt.err (!%p58_p2)
}
   0x8   :  { %s62_s15 = scalar_lea.vmem %s15_s7, 256  ;;  %p67_p4 = scmp.lt.s32.totalorder %s15_s7, %s15_s7 }
   0x9   :  { %p63_p3 = scmp.ne.s32.totalorder %s15_s7, %s62_s15  ;;  %p68_p5 = scmp.lt.s32.totalorder %s62_s15, %s62_s15 }
   0xb   :  { %p69_p6 = por %p68_p5, %p67_p4 }
   0xd   :  { %p70_p7 = pnand %p69_p6, %p63_p3 }
   0xf   :  { %73 = shalt.err (!%p70_p7)
}
  0x10   :  { %17 = dma.hbm_to_vmem [thread:$0]  %s137_s0, 256, %s15_s7, [#allocation3]  }
  0x11   :  { %96 = dma.done.wait [#allocation3], 256  }
  0x12   :  { %97 = vsyncadd [#allocation3], 4294967040  ;;  %v21_v0 = vld [vmem:[#allocation2] sm:$0xff]  ;;  %s101_s18 = smov 1   ;;  %v22_v1 = vld [vmem:[#allocation2 + $0x8] sm:$0xff]  ;;  %v27_v2 = vlaneseq  ;;  %s102_s19 = smov [#allocation5]  }
  0x13   :  { %23 = vrot.lane.b32.xlu0 %v21_v0, %s101_s18  ;;  %s40_s20 = sshll.u32 %s102_s19, 4  ;;  %s41_s20 = int_to_ptr.vmem [resolvable:$true] %s40_s20 }
  0x14   :  { %v28_v3 = vand.u32 127, %v27_v2  ;;  %s74_s0 = scalar_lea.vmem %s41_s20, 256  ;;  %p79_p9 = scmp.lt.s32.totalorder %s41_s20, %s41_s20 }
  0x15   :  { %p75_p8 = scmp.ne.s32.totalorder %s41_s20, %s74_s0  ;;  %p80_p10 = scmp.lt.s32.totalorder %s74_s0, %s74_s0 }
  0x16   :  { %vm29_vm0 = vcmp.lt.s32.totalorder %v28_v3, 1 }
  0x17   :  { %25 = vrot.lane.b32.xlu0 %v22_v1, %s101_s18  ;;  %p81_p11 = por %p80_p10, %p79_p9 }
  0x19   :  { %p82_p12 = pnand %p81_p11, %p75_p8 }
  0x85   :  { %v24_v4 = vpop.permute.xlu0 %23 }
  0x89   :  { %v26_v5 = vpop.permute.xlu0 %25 }
  0x8a   :  { %v30_v6 = vsel %vm29_vm0, %v24_v4, %v26_v5  ;;  %v31_v7 = vsel %vm29_vm0, %v26_v5, %v24_v4 }
  0x8b   :  { %32 = vst [vmem:[#allocation5] sm:$0xff] %v31_v7  ;;  %33 = vst [vmem:[#allocation5 + $0x8] sm:$0xff] %v30_v6 }
  0x8c   :  { %85 = shalt.err (!%p82_p12)
}
  0x8d   :  { %s86_s23 = scalar_lea.hbm %s138_s1, 256 }
  0x8e   :  { %p87_p13 = scmp.ne.s32.totalorder %s138_s1, %s86_s23  ;;  %p90_p0 = scmp.lt.u32.totalorder %s86_s23, %s138_s1 }
  0x90   :  { %p92_p1 = pnand %p90_p0, %p87_p13 }
  0x92   :  { %95 = shalt.err (!%p92_p1)
}
  0x93   :  { %43 = dma.vmem_to_hbm [thread:$0]  %s41_s20, 256, %s138_s1, [#allocation4]  }
  0x94   :  { %98 = dma.done.wait [#allocation4], 256  }
  0x95   :  { %99 = vsyncadd [#allocation4], 4294967040 }
  0x96   :  { %47 = vsyncpa [#allocation3], 1 }
  0x97   :  { %48 = vsyncpa [#allocation4], 1 }

</bundles_post_ra>
